<compile_context>
chip_gen: v6e
topology: v6e:2x2x1
jax: 0.10.0
libtpu: 0.0.40
codegen_flags: <defaults>
</compile_context>

<pallas_src>
import math

import jax
import jax.numpy as jnp
import numpy as np
from jax.experimental import pallas as pl
from jax.experimental.pallas import tpu as pltpu

# --- "config" (synthetic, small) -------------------------------------------
BATCH = 2
SEQ = 8
HIDDEN = 32
NUM_HEADS = 4
HEAD_DIM = HIDDEN // NUM_HEADS  # 8
SCALE = 1.0 / math.sqrt(HEAD_DIM)
# attention_probs_dropout_prob -> identity in eval mode (no dropout applied).
# position_embedding_type == 'absolute' -> no relative-key terms.
# TODO(synk): attention_mask / head_mask / cross-attention / kv-cache paths of
# the PyTorch module are not implemented (self-attention forward only).


def qformer_attn_kernel(x_ref, w_ref, b_ref,
                        ctx_ref, key_ref, val_ref, probs_ref):
    # x_ref: (B*S, H) flattened hidden states; w_ref: (H, 3H) fused & pre-
    # transposed QKV weight; b_ref: (1, 3H) fused bias.
    x = x_ref[...]  # (B*S, H)

    # Single fused projection on the MXU: (B*S, H) @ (H, 3H) + bias.
    qkv = jnp.dot(x, w_ref[...], preferred_element_type=jnp.float32) + b_ref[...]
    q = qkv[:, :HIDDEN]                 # (B*S, H)
    k = qkv[:, HIDDEN:2 * HIDDEN]       # (B*S, H)
    v = qkv[:, 2 * HIDDEN:]             # (B*S, H)

    # past_key_value outputs: lane-dense full-slab stores (heads are contiguous
    # slices of the hidden dim, so (B*S, H) already holds the per-head layout).
    key_ref[...] = k.astype(key_ref.dtype)
    val_ref[...] = v.astype(val_ref.dtype)

    # Leading-dim-only reshapes (layout preserving) for batched attention.
    q3 = q.reshape(BATCH, SEQ, HIDDEN)
    k3 = k.reshape(BATCH, SEQ, HIDDEN)
    v3 = v.reshape(BATCH, SEQ, HIDDEN)

    ctx_parts = []
    prob_parts = []
    for hh in range(NUM_HEADS):  # static, 4 iterations; each einsum is batched over B
        lo = hh * HEAD_DIM
        hi = lo + HEAD_DIM
        qh = q3[:, :, lo:hi]  # (B, S, D)
        kh = k3[:, :, lo:hi]
        vh = v3[:, :, lo:hi]

        # attention_scores = q @ k^T / sqrt(d)   (batched over B)
        scores = jnp.einsum("bqd,bkd->bqk", qh, kh,
                            preferred_element_type=jnp.float32) * SCALE

        # numerically stabilized softmax; denominator reciprocal on the EUP.
        scores = scores - jnp.max(scores, axis=-1, keepdims=True)
        e = jnp.exp(scores)
        inv = pl.reciprocal(jnp.sum(e, axis=-1, keepdims=True), approx=True)
        p = e * inv                                           # (B, S, S)

        prob_parts.append(p)
        ctx_parts.append(jnp.einsum("bqk,bkd->bqd", p, vh,
                                    preferred_element_type=jnp.float32))

    # Concatenate heads along lanes and store once, lane-dense.
    ctx = jnp.concatenate(ctx_parts, axis=-1).reshape(BATCH * SEQ, HIDDEN)
    probs = jnp.concatenate(prob_parts, axis=-1).reshape(BATCH * SEQ,
                                                         NUM_HEADS * SEQ)
    ctx_ref[...] = ctx.astype(ctx_ref.dtype)
    probs_ref[...] = probs.astype(probs_ref.dtype)


def blip2_qformer_self_attention(hidden_states, wq, bq, wk, bk, wv, bv):
    """Returns (context_layer, attention_probs, (key_layer, value_layer))."""
    B, S, H = hidden_states.shape
    assert B == BATCH and S == SEQ and H == HIDDEN
    NH, D = NUM_HEADS, HEAD_DIM

    # Host-side weight prep (free layout plumbing): fuse and pre-transpose QKV.
    x2 = hidden_states.reshape(B * S, H)
    w_fused = jnp.concatenate([wq, wk, wv], axis=0).T          # (H, 3H)
    b_fused = jnp.concatenate([bq, bk, bv]).reshape(1, 3 * H)  # (1, 3H)

    full2 = lambda shape: pl.BlockSpec(shape, lambda i: (0, 0))

    out_shapes = (
        jax.ShapeDtypeStruct((B * S, H), jnp.float32),        # context (flat)
        jax.ShapeDtypeStruct((B * S, H), jnp.float32),        # key (flat)
        jax.ShapeDtypeStruct((B * S, H), jnp.float32),        # value (flat)
        jax.ShapeDtypeStruct((B * S, NH * S), jnp.float32),   # probs (flat)
    )

    ctx2, k2, v2, p2 = pl.pallas_call(
        qformer_attn_kernel,
        out_shape=out_shapes,
        grid=(1,),
        in_specs=[
            full2((B * S, H)),      # hidden states (flattened)
            full2((H, 3 * H)),      # fused QKV weight (pre-transposed)
            full2((1, 3 * H)),      # fused QKV bias
        ],
        out_specs=(
            full2((B * S, H)),
            full2((B * S, H)),
            full2((B * S, H)),
            full2((B * S, NH * S)),
        ),
        compiler_params=pltpu.CompilerParams(
            dimension_semantics=("arbitrary",)),
    )(x2, w_fused, b_fused)

    # Wrapper-side reshapes into the module's output layouts.
    context_layer = ctx2.reshape(B, S, H)
    key_layer = k2.reshape(B, S, NH, D).transpose(0, 2, 1, 3)
    value_layer = v2.reshape(B, S, NH, D).transpose(0, 2, 1, 3)
    attention_probs = p2.reshape(B, S, NH, S).transpose(0, 2, 1, 3)
    return context_layer, attention_probs, (key_layer, value_layer)


def _reference(hidden_states, wq, bq, wk, bk, wv, bv):
    """Pure-JAX mirror of the PyTorch forward (self-attention, no mask)."""
    B, S, H = hidden_states.shape

    def split_heads(x):  # (B, S, H) -> (B, NH, S, D)
        return x.reshape(B, S, NUM_HEADS, HEAD_DIM).transpose(0, 2, 1, 3)

    q = split_heads(hidden_states @ wq.T + bq)
    k = split_heads(hidden_states @ wk.T + bk)
    v = split_heads(hidden_states @ wv.T + bv)
    scores = jnp.einsum("bhqd,bhkd->bhqk", q, k) * SCALE
    probs = jax.nn.softmax(scores, axis=-1)
    ctx = jnp.einsum("bhqk,bhkd->bhqd", probs, v)
    ctx = ctx.transpose(0, 2, 1, 3).reshape(B, S, H)
    return ctx, probs, (k, v)


if __name__ == "__main__":
    key = jax.random.PRNGKey(0)
    keys = jax.random.split(key, 7)

    hidden_states = jax.random.normal(keys[0], (BATCH, SEQ, HIDDEN), jnp.float32)

    # Deterministic synthetic nn.Linear parameters (W: [out, in], b: [out]).
    init_scale = 1.0 / math.sqrt(HIDDEN)
    wq = jax.random.uniform(keys[1], (HIDDEN, HIDDEN), jnp.float32, -init_scale, init_scale)
    bq = jax.random.uniform(keys[2], (HIDDEN,), jnp.float32, -init_scale, init_scale)
    wk = jax.random.uniform(keys[3], (HIDDEN, HIDDEN), jnp.float32, -init_scale, init_scale)
    bk = jax.random.uniform(keys[4], (HIDDEN,), jnp.float32, -init_scale, init_scale)
    wv = jax.random.uniform(keys[5], (HIDDEN, HIDDEN), jnp.float32, -init_scale, init_scale)
    bv = jax.random.uniform(keys[6], (HIDDEN,), jnp.float32, -init_scale, init_scale)

    ctx, probs, (k_layer, v_layer) = blip2_qformer_self_attention(
        hidden_states, wq, bq, wk, bk, wv, bv)
    jax.block_until_ready(ctx)

    # Sanity-check against a pure-JAX reference of the PyTorch forward.
    ctx_r, probs_r, (k_r, v_r) = _reference(hidden_states, wq, bq, wk, bk, wv, bv)
    # key/value are exact (pure matmul); ctx/probs tolerance allows the
    # approx=True EUP reciprocal in the softmax denominator.
    np.testing.assert_allclose(np.asarray(k_layer), np.asarray(k_r), rtol=1e-4, atol=1e-4)
    np.testing.assert_allclose(np.asarray(v_layer), np.asarray(v_r), rtol=1e-4, atol=1e-4)
    np.testing.assert_allclose(np.asarray(ctx), np.asarray(ctx_r), rtol=2e-3, atol=2e-3)
    np.testing.assert_allclose(np.asarray(probs), np.asarray(probs_r), rtol=2e-3, atol=2e-3)

    print("KERNEL_OK")
</pallas_src>

<mosaic_0001>
module attributes {stable_mosaic.version = 11 : i64} {
  func.func @qformer_attn_kernel(%arg0: i32, %arg1: memref<16x32xf32, #tpu.memory_space<vmem>>, %arg2: memref<32x96xf32, #tpu.memory_space<vmem>>, %arg3: memref<1x96xf32, #tpu.memory_space<vmem>>, %arg4: memref<16x32xf32, #tpu.memory_space<vmem>>, %arg5: memref<16x32xf32, #tpu.memory_space<vmem>>, %arg6: memref<16x32xf32, #tpu.memory_space<vmem>>, %arg7: memref<16x32xf32, #tpu.memory_space<vmem>>) attributes {dimension_semantics = [#tpu.dimension_semantics<arbitrary>], iteration_bounds = array<i64: 1>, scalar_prefetch = 0 : i64, scratch_operands = 0 : i64, tpu.core_type = #tpu.core_type<tc>, window_params = [{pipeline_mode = #tpu.pipeline_mode<synchronous>, transform_indices = @transform_0, window_bounds = array<i64: 16, 32>}, {pipeline_mode = #tpu.pipeline_mode<synchronous>, transform_indices = @transform_1, window_bounds = array<i64: 32, 96>}, {pipeline_mode = #tpu.pipeline_mode<synchronous>, transform_indices = @transform_2, window_bounds = array<i64: 1, 96>}, {pipeline_mode = #tpu.pipeline_mode<synchronous>, transform_indices = @transform_3, window_bounds = array<i64: 16, 32>}, {pipeline_mode = #tpu.pipeline_mode<synchronous>, transform_indices = @transform_4, window_bounds = array<i64: 16, 32>}, {pipeline_mode = #tpu.pipeline_mode<synchronous>, transform_indices = @transform_5, window_bounds = array<i64: 16, 32>}, {pipeline_mode = #tpu.pipeline_mode<synchronous>, transform_indices = @transform_6, window_bounds = array<i64: 16, 32>}]} {
    %c0 = arith.constant 0 : index
    %c0_0 = arith.constant 0 : index
    %0 = vector.load %arg1[%c0, %c0_0] : memref<16x32xf32, #tpu.memory_space<vmem>>, vector<16x32xf32>
    %c0_1 = arith.constant 0 : index
    %c0_2 = arith.constant 0 : index
    %1 = vector.load %arg2[%c0_1, %c0_2] : memref<32x96xf32, #tpu.memory_space<vmem>>, vector<32x96xf32>
    %cst = arith.constant dense<0.000000e+00> : vector<16x96xf32>
    %2 = tpu.matmul %0, %1, %cst {dimension_numbers = #tpu.dot_dimension_numbers<[1], [0], [0], [1], [0, 0, 1, 1], [], []>} : vector<16x32xf32>, vector<32x96xf32>, vector<16x96xf32> -> vector<16x96xf32>
    %c0_3 = arith.constant 0 : index
    %c0_4 = arith.constant 0 : index
    %3 = vector.load %arg3[%c0_3, %c0_4] : memref<1x96xf32, #tpu.memory_space<vmem>>, vector<1x96xf32>
    %4 = vector.broadcast %3 : vector<1x96xf32> to vector<16x96xf32>
    %5 = arith.addf %2, %4 : vector<16x96xf32>
    %6 = vector.extract_strided_slice %5 {offsets = [0, 0], sizes = [16, 32], strides = [1, 1]} : vector<16x96xf32> to vector<16x32xf32>
    %7 = vector.extract_strided_slice %5 {offsets = [0, 32], sizes = [16, 32], strides = [1, 1]} : vector<16x96xf32> to vector<16x32xf32>
    %8 = vector.extract_strided_slice %5 {offsets = [0, 64], sizes = [16, 32], strides = [1, 1]} : vector<16x96xf32> to vector<16x32xf32>
    %c0_5 = arith.constant 0 : index
    %c0_6 = arith.constant 0 : index
    %9 = vector.load %arg5[%c0_5, %c0_6] : memref<16x32xf32, #tpu.memory_space<vmem>>, vector<16x32xf32>
    tpu.vector_store %arg5[%c0_5, %c0_6], %7 {strides = array<i32>} : memref<16x32xf32, #tpu.memory_space<vmem>>, vector<16x32xf32>,
    %c0_7 = arith.constant 0 : index
    %c0_8 = arith.constant 0 : index
    %10 = vector.load %arg6[%c0_7, %c0_8] : memref<16x32xf32, #tpu.memory_space<vmem>>, vector<16x32xf32>
    tpu.vector_store %arg6[%c0_7, %c0_8], %8 {strides = array<i32>} : memref<16x32xf32, #tpu.memory_space<vmem>>, vector<16x32xf32>,
    %11 = vector.shape_cast %6 : vector<16x32xf32> to vector<2x8x32xf32>
    %12 = vector.shape_cast %7 : vector<16x32xf32> to vector<2x8x32xf32>
    %13 = vector.shape_cast %8 : vector<16x32xf32> to vector<2x8x32xf32>
    %14 = vector.extract_strided_slice %11 {offsets = [0, 0, 0], sizes = [2, 8, 8], strides = [1, 1, 1]} : vector<2x8x32xf32> to vector<2x8x8xf32>
    %15 = vector.extract_strided_slice %12 {offsets = [0, 0, 0], sizes = [2, 8, 8], strides = [1, 1, 1]} : vector<2x8x32xf32> to vector<2x8x8xf32>
    %16 = vector.extract_strided_slice %13 {offsets = [0, 0, 0], sizes = [2, 8, 8], strides = [1, 1, 1]} : vector<2x8x32xf32> to vector<2x8x8xf32>
    "tpu.trace_start"() <{level = 10 : i32, message = "bqd,bkd->bqk"}> : () -> ()
    %cst_9 = arith.constant dense<0.000000e+00> : vector<2x8x8xf32>
    %17 = tpu.matmul %14, %15, %cst_9 {dimension_numbers = #tpu.dot_dimension_numbers<[2], [2], [1], [1], [0, 0, 0, 1, 1, 1], [0], [0]>} : vector<2x8x8xf32>, vector<2x8x8xf32>, vector<2x8x8xf32> -> vector<2x8x8xf32>
    "tpu.trace_stop"() : () -> ()
    %cst_10 = arith.constant 0.353553385 : f32
    %18 = vector.broadcast %cst_10 : f32 to vector<2x8x8xf32>
    %19 = arith.mulf %17, %18 : vector<2x8x8xf32>
    %cst_11 = arith.constant dense<0xFF800000> : vector<2x8xf32>
    %20 = vector.multi_reduction <maximumf>, %19, %cst_11 [2] : vector<2x8x8xf32> to vector<2x8xf32>
    %21 = vector.shape_cast %20 : vector<2x8xf32> to vector<2x8x1xf32>
    %22 = vector.broadcast %21 : vector<2x8x1xf32> to vector<2x8x8xf32>
    %23 = arith.subf %19, %22 : vector<2x8x8xf32>
    %24 = math.exp %23 : vector<2x8x8xf32>
    %cst_12 = arith.constant dense<0.000000e+00> : vector<2x8xf32>
    %25 = vector.multi_reduction <add>, %24, %cst_12 [2] : vector<2x8x8xf32> to vector<2x8xf32>
    %26 = vector.shape_cast %25 : vector<2x8xf32> to vector<2x8x1xf32>
    %27 = tpu.reciprocal %26 {approx = true} : vector<2x8x1xf32> -> vector<2x8x1xf32>
    %28 = vector.broadcast %27 : vector<2x8x1xf32> to vector<2x8x8xf32>
    %29 = arith.mulf %24, %28 : vector<2x8x8xf32>
    "tpu.trace_start"() <{level = 10 : i32, message = "bqk,bkd->bqd"}> : () -> ()
    %cst_13 = arith.constant dense<0.000000e+00> : vector<2x8x8xf32>
    %30 = tpu.matmul %29, %16, %cst_13 {dimension_numbers = #tpu.dot_dimension_numbers<[2], [1], [1], [2], [0, 0, 0, 1, 1, 2], [0], [0]>} : vector<2x8x8xf32>, vector<2x8x8xf32>, vector<2x8x8xf32> -> vector<2x8x8xf32>
    "tpu.trace_stop"() : () -> ()
    %31 = vector.extract_strided_slice %11 {offsets = [0, 0, 8], sizes = [2, 8, 8], strides = [1, 1, 1]} : vector<2x8x32xf32> to vector<2x8x8xf32>
    %32 = vector.extract_strided_slice %12 {offsets = [0, 0, 8], sizes = [2, 8, 8], strides = [1, 1, 1]} : vector<2x8x32xf32> to vector<2x8x8xf32>
    %33 = vector.extract_strided_slice %13 {offsets = [0, 0, 8], sizes = [2, 8, 8], strides = [1, 1, 1]} : vector<2x8x32xf32> to vector<2x8x8xf32>
    "tpu.trace_start"() <{level = 10 : i32, message = "bqd,bkd->bqk"}> : () -> ()
    %cst_14 = arith.constant dense<0.000000e+00> : vector<2x8x8xf32>
    %34 = tpu.matmul %31, %32, %cst_14 {dimension_numbers = #tpu.dot_dimension_numbers<[2], [2], [1], [1], [0, 0, 0, 1, 1, 1], [0], [0]>} : vector<2x8x8xf32>, vector<2x8x8xf32>, vector<2x8x8xf32> -> vector<2x8x8xf32>
    "tpu.trace_stop"() : () -> ()
    %cst_15 = arith.constant 0.353553385 : f32
    %35 = vector.broadcast %cst_15 : f32 to vector<2x8x8xf32>
    %36 = arith.mulf %34, %35 : vector<2x8x8xf32>
    %cst_16 = arith.constant dense<0xFF800000> : vector<2x8xf32>
    %37 = vector.multi_reduction <maximumf>, %36, %cst_16 [2] : vector<2x8x8xf32> to vector<2x8xf32>
    %38 = vector.shape_cast %37 : vector<2x8xf32> to vector<2x8x1xf32>
    %39 = vector.broadcast %38 : vector<2x8x1xf32> to vector<2x8x8xf32>
    %40 = arith.subf %36, %39 : vector<2x8x8xf32>
    %41 = math.exp %40 : vector<2x8x8xf32>
    %cst_17 = arith.constant dense<0.000000e+00> : vector<2x8xf32>
    %42 = vector.multi_reduction <add>, %41, %cst_17 [2] : vector<2x8x8xf32> to vector<2x8xf32>
    %43 = vector.shape_cast %42 : vector<2x8xf32> to vector<2x8x1xf32>
    %44 = tpu.reciprocal %43 {approx = true} : vector<2x8x1xf32> -> vector<2x8x1xf32>
    %45 = vector.broadcast %44 : vector<2x8x1xf32> to vector<2x8x8xf32>
    %46 = arith.mulf %41, %45 : vector<2x8x8xf32>
    "tpu.trace_start"() <{level = 10 : i32, message = "bqk,bkd->bqd"}> : () -> ()
    %cst_18 = arith.constant dense<0.000000e+00> : vector<2x8x8xf32>
    %47 = tpu.matmul %46, %33, %cst_18 {dimension_numbers = #tpu.dot_dimension_numbers<[2], [1], [1], [2], [0, 0, 0, 1, 1, 2], [0], [0]>} : vector<2x8x8xf32>, vector<2x8x8xf32>, vector<2x8x8xf32> -> vector<2x8x8xf32>
    "tpu.trace_stop"() : () -> ()
    %48 = vector.extract_strided_slice %11 {offsets = [0, 0, 16], sizes = [2, 8, 8], strides = [1, 1, 1]} : vector<2x8x32xf32> to vector<2x8x8xf32>
    %49 = vector.extract_strided_slice %12 {offsets = [0, 0, 16], sizes = [2, 8, 8], strides = [1, 1, 1]} : vector<2x8x32xf32> to vector<2x8x8xf32>
    %50 = vector.extract_strided_slice %13 {offsets = [0, 0, 16], sizes = [2, 8, 8], strides = [1, 1, 1]} : vector<2x8x32xf32> to vector<2x8x8xf32>
    "tpu.trace_start"() <{level = 10 : i32, message = "bqd,bkd->bqk"}> : () -> ()
    %cst_19 = arith.constant dense<0.000000e+00> : vector<2x8x8xf32>
    %51 = tpu.matmul %48, %49, %cst_19 {dimension_numbers = #tpu.dot_dimension_numbers<[2], [2], [1], [1], [0, 0, 0, 1, 1, 1], [0], [0]>} : vector<2x8x8xf32>, vector<2x8x8xf32>, vector<2x8x8xf32> -> vector<2x8x8xf32>
    "tpu.trace_stop"() : () -> ()
    %cst_20 = arith.constant 0.353553385 : f32
    %52 = vector.broadcast %cst_20 : f32 to vector<2x8x8xf32>
    %53 = arith.mulf %51, %52 : vector<2x8x8xf32>
    %cst_21 = arith.constant dense<0xFF800000> : vector<2x8xf32>
    %54 = vector.multi_reduction <maximumf>, %53, %cst_21 [2] : vector<2x8x8xf32> to vector<2x8xf32>
    %55 = vector.shape_cast %54 : vector<2x8xf32> to vector<2x8x1xf32>
    %56 = vector.broadcast %55 : vector<2x8x1xf32> to vector<2x8x8xf32>
    %57 = arith.subf %53, %56 : vector<2x8x8xf32>
    %58 = math.exp %57 : vector<2x8x8xf32>
    %cst_22 = arith.constant dense<0.000000e+00> : vector<2x8xf32>
    %59 = vector.multi_reduction <add>, %58, %cst_22 [2] : vector<2x8x8xf32> to vector<2x8xf32>
    %60 = vector.shape_cast %59 : vector<2x8xf32> to vector<2x8x1xf32>
    %61 = tpu.reciprocal %60 {approx = true} : vector<2x8x1xf32> -> vector<2x8x1xf32>
    %62 = vector.broadcast %61 : vector<2x8x1xf32> to vector<2x8x8xf32>
    %63 = arith.mulf %58, %62 : vector<2x8x8xf32>
    "tpu.trace_start"() <{level = 10 : i32, message = "bqk,bkd->bqd"}> : () -> ()
    %cst_23 = arith.constant dense<0.000000e+00> : vector<2x8x8xf32>
    %64 = tpu.matmul %63, %50, %cst_23 {dimension_numbers = #tpu.dot_dimension_numbers<[2], [1], [1], [2], [0, 0, 0, 1, 1, 2], [0], [0]>} : vector<2x8x8xf32>, vector<2x8x8xf32>, vector<2x8x8xf32> -> vector<2x8x8xf32>
    "tpu.trace_stop"() : () -> ()
    %65 = vector.extract_strided_slice %11 {offsets = [0, 0, 24], sizes = [2, 8, 8], strides = [1, 1, 1]} : vector<2x8x32xf32> to vector<2x8x8xf32>
    %66 = vector.extract_strided_slice %12 {offsets = [0, 0, 24], sizes = [2, 8, 8], strides = [1, 1, 1]} : vector<2x8x32xf32> to vector<2x8x8xf32>
    %67 = vector.extract_strided_slice %13 {offsets = [0, 0, 24], sizes = [2, 8, 8], strides = [1, 1, 1]} : vector<2x8x32xf32> to vector<2x8x8xf32>
    "tpu.trace_start"() <{level = 10 : i32, message = "bqd,bkd->bqk"}> : () -> ()
    %cst_24 = arith.constant dense<0.000000e+00> : vector<2x8x8xf32>
    %68 = tpu.matmul %65, %66, %cst_24 {dimension_numbers = #tpu.dot_dimension_numbers<[2], [2], [1], [1], [0, 0, 0, 1, 1, 1], [0], [0]>} : vector<2x8x8xf32>, vector<2x8x8xf32>, vector<2x8x8xf32> -> vector<2x8x8xf32>
    "tpu.trace_stop"() : () -> ()
    %cst_25 = arith.constant 0.353553385 : f32
    %69 = vector.broadcast %cst_25 : f32 to vector<2x8x8xf32>
    %70 = arith.mulf %68, %69 : vector<2x8x8xf32>
    %cst_26 = arith.constant dense<0xFF800000> : vector<2x8xf32>
    %71 = vector.multi_reduction <maximumf>, %70, %cst_26 [2] : vector<2x8x8xf32> to vector<2x8xf32>
    %72 = vector.shape_cast %71 : vector<2x8xf32> to vector<2x8x1xf32>
    %73 = vector.broadcast %72 : vector<2x8x1xf32> to vector<2x8x8xf32>
    %74 = arith.subf %70, %73 : vector<2x8x8xf32>
    %75 = math.exp %74 : vector<2x8x8xf32>
    %cst_27 = arith.constant dense<0.000000e+00> : vector<2x8xf32>
    %76 = vector.multi_reduction <add>, %75, %cst_27 [2] : vector<2x8x8xf32> to vector<2x8xf32>
    %77 = vector.shape_cast %76 : vector<2x8xf32> to vector<2x8x1xf32>
    %78 = tpu.reciprocal %77 {approx = true} : vector<2x8x1xf32> -> vector<2x8x1xf32>
    %79 = vector.broadcast %78 : vector<2x8x1xf32> to vector<2x8x8xf32>
    %80 = arith.mulf %75, %79 : vector<2x8x8xf32>
    "tpu.trace_start"() <{level = 10 : i32, message = "bqk,bkd->bqd"}> : () -> ()
    %cst_28 = arith.constant dense<0.000000e+00> : vector<2x8x8xf32>
    %81 = tpu.matmul %80, %67, %cst_28 {dimension_numbers = #tpu.dot_dimension_numbers<[2], [1], [1], [2], [0, 0, 0, 1, 1, 2], [0], [0]>} : vector<2x8x8xf32>, vector<2x8x8xf32>, vector<2x8x8xf32> -> vector<2x8x8xf32>
    "tpu.trace_stop"() : () -> ()
    %82 = tpu.concatenate %30, %47, %64, %81 in 2 : vector<2x8x8xf32>, vector<2x8x8xf32>, vector<2x8x8xf32>, vector<2x8x8xf32> -> vector<2x8x32xf32>
    %83 = vector.shape_cast %82 : vector<2x8x32xf32> to vector<16x32xf32>
    %84 = tpu.concatenate %29, %46, %63, %80 in 2 : vector<2x8x8xf32>, vector<2x8x8xf32>, vector<2x8x8xf32>, vector<2x8x8xf32> -> vector<2x8x32xf32>
    %85 = vector.shape_cast %84 : vector<2x8x32xf32> to vector<16x32xf32>
    %c0_29 = arith.constant 0 : index
    %c0_30 = arith.constant 0 : index
    %86 = vector.load %arg4[%c0_29, %c0_30] : memref<16x32xf32, #tpu.memory_space<vmem>>, vector<16x32xf32>
    tpu.vector_store %arg4[%c0_29, %c0_30], %83 {strides = array<i32>} : memref<16x32xf32, #tpu.memory_space<vmem>>, vector<16x32xf32>,
    %c0_31 = arith.constant 0 : index
    %c0_32 = arith.constant 0 : index
    %87 = vector.load %arg7[%c0_31, %c0_32] : memref<16x32xf32, #tpu.memory_space<vmem>>, vector<16x32xf32>
    tpu.vector_store %arg7[%c0_31, %c0_32], %85 {strides = array<i32>} : memref<16x32xf32, #tpu.memory_space<vmem>>, vector<16x32xf32>,
    return
  }
  func.func @transform_0(%arg0: i32) -> (i32, i32) {
    %c0_i32 = arith.constant 0 : i32
    %c0_i32_0 = arith.constant 0 : i32
    %c0_i32_1 = arith.constant 0 : i32
    return %c0_i32, %c0_i32_0 : i32, i32
  }
  func.func @transform_1(%arg0: i32) -> (i32, i32) {
    %c0_i32 = arith.constant 0 : i32
    %c0_i32_0 = arith.constant 0 : i32
    %c0_i32_1 = arith.constant 0 : i32
    return %c0_i32, %c0_i32_0 : i32, i32
  }
  func.func @transform_2(%arg0: i32) -> (i32, i32) {
    %c0_i32 = arith.constant 0 : i32
    %c0_i32_0 = arith.constant 0 : i32
    %c0_i32_1 = arith.constant 0 : i32
    return %c0_i32, %c0_i32_0 : i32, i32
  }
  func.func @transform_3(%arg0: i32) -> (i32, i32) {
    %c0_i32 = arith.constant 0 : i32
    %c0_i32_0 = arith.constant 0 : i32
    %c0_i32_1 = arith.constant 0 : i32
    return %c0_i32, %c0_i32_0 : i32, i32
  }
  func.func @transform_4(%arg0: i32) -> (i32, i32) {
    %c0_i32 = arith.constant 0 : i32
    %c0_i32_0 = arith.constant 0 : i32
    %c0_i32_1 = arith.constant 0 : i32
    return %c0_i32, %c0_i32_0 : i32, i32
  }
  func.func @transform_5(%arg0: i32) -> (i32, i32) {
    %c0_i32 = arith.constant 0 : i32
    %c0_i32_0 = arith.constant 0 : i32
    %c0_i32_1 = arith.constant 0 : i32
    return %c0_i32, %c0_i32_0 : i32, i32
  }
  func.func @transform_6(%arg0: i32) -> (i32, i32) {
    %c0_i32 = arith.constant 0 : i32
    %c0_i32_0 = arith.constant 0 : i32
    %c0_i32_1 = arith.constant 0 : i32
    return %c0_i32, %c0_i32_0 : i32, i32
  }
}

</mosaic_0001>

<bundles_post_ra>
// kernel: tpu_custom_call.1
= control target key start
LH: loop header
LB: loop body
LE: loop exit
PB: predicated region body
PF: predicated region fallthrough
CT: control target
= control target key end

     0   :  { %12 = vsyncpa [#allocation3], 0  ;;  %s2210_s0 = inlined_call_operand.hbm [shape: f32[16,32], index: 0, kind: input, shape index: {}]   ;;  %s2211_s1 = inlined_call_operand.hbm [shape: f32[32,96], index: 1, kind: input, shape index: {}]   ;;  %s2212_s2 = inlined_call_operand.vmem [shape: f32[1,96], index: 2, kind: input, shape index: {}]   ;;  %s2213_s3 = inlined_call_operand.hbm [shape: f32[16,32], index: 3, kind: output, shape index: {0}]   ;;  %s2214_s4 = inlined_call_operand.hbm [shape: f32[16,32], index: 4, kind: output, shape index: {1}]   ;;  %s2215_s5 = inlined_call_operand.hbm [shape: f32[16,32], index: 5, kind: output, shape index: {2}]   ;;  %s2216_s6 = inlined_call_operand.hbm [shape: f32[16,32], index: 6, kind: output, shape index: {3}]  }
   0x1   :  { %13 = vsyncpa [#allocation6], 0 }
   0x2   :  { %14 = vsyncpa [#allocation4], 0 }
   0x3   :  { %15 = vsyncpa [#allocation9], 0 }
   0x4   :  { %16 = vsyncpa [#allocation12], 0  ;;  %s1943_s21 = smov [#allocation2]  }
   0x5   :  { %s22_s22 = sshll.u32 %s1943_s21, 4  ;;  %s23_s22 = int_to_ptr.vmem [resolvable:$true] %s22_s22 }
   0x6   :  { %s1821_s23 = scalar_lea.vmem %s23_s22, 256  ;;  %p1826_p1 = scmp.lt.s32.totalorder %s23_s22, %s23_s22 }
   0x7   :  { %p1822_p0 = scmp.ne.s32.totalorder %s23_s22, %s1821_s23  ;;  %p1827_p2 = scmp.lt.s32.totalorder %s1821_s23, %s1821_s23 }
   0x9   :  { %p1828_p3 = por %p1827_p2, %p1826_p1 }
   0xb   :  { %p1829_p4 = pnand %p1828_p3, %p1822_p0 }
   0xd   :  { %1832 = shalt.err (!%p1829_p4)
}
   0xe   :  { %s1944_s24 = smov 128   ;;  %s1945_s25 = smov 8  }
   0xf   :  { %28 = dma.hbm_to_vmem [thread:$0]  %s2210_s0, 256, %s23_s22, [#allocation3], %s1944_s24, %s1944_s24, %s1945_s25  }
  0x10   :  { %s1946_s28 = smov [#allocation5]  }
  0x11   :  { %s34_s29 = sshll.u32 %s1946_s28, 4  ;;  %s35_s29 = int_to_ptr.vmem [resolvable:$true] %s34_s29 }
  0x12   :  { %s1841_s30 = scalar_lea.vmem %s35_s29, 512  ;;  %p1846_p6 = scmp.lt.s32.totalorder %s35_s29, %s35_s29 }
  0x13   :  { %p1842_p5 = scmp.ne.s32.totalorder %s35_s29, %s1841_s30  ;;  %p1847_p7 = scmp.lt.s32.totalorder %s1841_s30, %s1841_s30 }
  0x15   :  { %p1848_p8 = por %p1847_p7, %p1846_p6 }
  0x17   :  { %p1849_p9 = pnand %p1848_p8, %p1842_p5 }
  0x19   :  { %1852 = shalt.err (!%p1849_p9)
}
  0x1a   :  { %40 = dma.hbm_to_vmem [thread:$0]  %s2211_s1, 512, %s35_s29, [#allocation6], %s1944_s24, %s1944_s24, %s1945_s25  }
  0x1b   :  { %1933 = dma.done.wait [#allocation3], 256  }
  0x1c   :  { %1934 = vsyncadd [#allocation3], 4294967040 }
  0x1d   :  { %1935 = dma.done.wait [#allocation6], 512  }
  0x1e   :  { %1936 = vsyncadd [#allocation6], 4294966784  ;;  %vm62_vm0 = vcmask 261120   ;;  %v54_v0 = vld [vmem:[#allocation5 + $0x18] sm:$0xff]  ;;  %v53_v1 = vld [vmem:[#allocation5 + $0x10] sm:$0xff]  ;;  %v1947_v6 = vmov 0.0  }
  0x1f   :  { %1667 = vmatprep.subr.mxu0 %v54_v0  ;;  %v49_v2 = vld [vmem:[#allocation2] sm:$0xff]  ;;  %v52_v3 = vld [vmem:[#allocation5 + $0x8] sm:$0xff]  ;;  %v51_v4 = vld [vmem:[#allocation5] sm:$0xff]  ;;  %1678 = vmatprep.subr.mxu1 %v1947_v6  ;;  %vm1948_vm1 = vmmov 0   ;;  %s1949_s9 = smov 96   ;;  %vm162_vm2 = vcmask 64512  }
  0x20   :  { %1668 = vmatpush3.msra.mxu0 %v54_v0  ;;  %1675 = vmatprep.mubr.msk.f32.mxu0 %vm62_vm0, %v49_v2  ;;  %v50_v5 = vld [vmem:[#allocation2 + $0x8] sm:$0xff]  ;;  %v1602_v8 = vld [vmem:[%s2212_s2] ss:$0 sm:$0xff]  ;;  %s1950_s2 = smov 64   ;;  %s1951_s10 = smov 88  }
  0x21   :  { %1669 = vmatprep.subr.mxu0 %v53_v1  ;;  %1680 = vmatprep.mubr.msk.f32.mxu1 %vm1948_vm1, %v1947_v6  ;;  %s1952_s11 = smov 120   ;;  %s1953_s12 = smov 56  }
  0x22   :  { %1670 = vmatpush3.msra.mxu0 %v53_v1  ;;  %s1954_s13 = smov 80   ;;  %s1955_s14 = smov 112  }
  0x23   :  { %1671 = vmatprep.subr.mxu0 %v52_v3  ;;  %s1956_s15 = smov 48   ;;  %s1957_s16 = smov 72  }
  0x24   :  { %1672 = vmatpush3.msra.mxu0 %v52_v3  ;;  %s1958_s17 = smov 104   ;;  %s1959_s18 = smov 40  }
  0x25   :  { %1673 = vmatprep.subr.mxu0 %v51_v4  ;;  %s1960_s19 = smov 16   ;;  %s1961_s20 = smov [#allocation8]  }
  0x26   :  { %1674 = vmatpush3.msra.mxu0 %v51_v4  ;;  %s1554_s21 = sshll.u32 %s1961_s20, 4  ;;  %s1555_s21 = int_to_ptr.vmem [resolvable:$true] %s1554_s21 }
  0x27   :  { %1676 = vmatmul.mubr.msk.f32.vlgmr.msra.gmra.mxu0 %vm62_vm0, %v50_v5  ;;  %1688 = vmatprep.subr.mxu0 %v1947_v6  ;;  %s1853_s22 = scalar_lea.vmem %s1555_s21, 256  ;;  %p1858_p11 = scmp.lt.s32.totalorder %s1555_s21, %s1555_s21 }
  0x28   :  { %1690 = vmatprep.mubr.msk.f32.mxu0 %vm1948_vm1, %v1947_v6  ;;  %p1854_p10 = scmp.ne.s32.totalorder %s1555_s21, %s1853_s22  ;;  %p1859_p12 = scmp.lt.s32.totalorder %s1853_s22, %s1853_s22 }
  0x2a   :  { %p1860_p13 = por %p1859_p12, %p1858_p11 }
  0x2c   :  { %p1861_p0 = pnand %p1860_p13, %p1854_p10 }
  0xe7   :  { %v1677_v7 = vpop.f32.mrf.mxu0 }
  0xe8   :  { %v2027_v11 = vadd.f32 %v1677_v7, %v1602_v8 }
  0xe9   :  { %v135_v9 = vpop.f32.mrf.mxu0 }
  0xea   :  { %v2024_v10 = vadd.f32 %v1602_v8, %v135_v9 }
  0xec   :  { %146 = vrot.lane.b32.xlu0 %v2024_v10, %s1949_s9 }
  0xf0   :  { %148 = vrot.lane.b32.xlu0 %v2027_v11, %s1949_s9 }
 0x15e   :  { %v147_v12 = vpop.permute.xlu0 %146 }
 0x15f   :  { %152 = vst.msk [vmem:[#allocation8] sm:$0xff] %vm62_vm0, %v147_v12  ;;  %1679 = vmatpush3.xpose.msk.msra.mxu1 %vm162_vm2, %v147_v12 }
 0x160   :  { %1683 = vmatprep.subr.mxu1 %v1947_v6 }
 0x162   :  { %1681 = vmatmul.mubr.msk.f32.vlgmr.msra.gmra.mxu1 %vm162_vm2, %v2024_v10  ;;  %v149_v13 = vpop.permute.xlu0 %148 }
 0x163   :  { %153 = vst.msk [vmem:[#allocation8 + $0x8] sm:$0xff] %vm62_vm0, %v149_v13  ;;  %1684 = vmatpush3.xpose.msk.msra.mxu1 %vm162_vm2, %v149_v13  ;;  %1685 = vmatprep.mubr.msk.f32.mxu1 %vm1948_vm1, %v1947_v6 }
 0x164   :  { %1693 = vmatprep.subr.mxu1 %v1947_v6 }
 0x166   :  { %1686 = vmatmul.mubr.msk.f32.vlgmr.msra.gmra.mxu1 %vm162_vm2, %v2027_v11 }
 0x167   :  { %1695 = vmatprep.mubr.msk.f32.mxu1 %vm1948_vm1, %v1947_v6 }
 0x222   :  { %v233_v14 = vpop.f32.mrf.mxu1 }
 0x223   :  { %v311_v15 = vmul.f32 0.35355338, %v233_v14 }
 0x224   :  { %v1682_v16 = vpop.f32.mrf.mxu1 }
 0x225   :  { %v313_v17 = vsel %vm162_vm2, %v311_v15, -inf }
 0x226   :  { %314 = vmax.xlane.f32.xlu1 %v313_v17  ;;  %v307_v18 = vpop.f32.mrf.mxu1 }
 0x227   :  { %v312_v19 = vmul.f32 0.35355338, %v307_v18 }
 0x228   :  { %v1687_v20 = vpop.f32.mrf.mxu1 }
 0x229   :  { %v316_v21 = vsel %vm162_vm2, %v312_v19, -inf }
 0x22a   :  { %317 = vmax.xlane.f32.xlu1 %v316_v21 }
 0x23b   :  { %154 = vrot.lane.b32.xlu1 %v2024_v10, %s1950_s2 }
 0x23f   :  { %156 = vrot.lane.b32.xlu1 %v2027_v11, %s1950_s2 }
 0x243   :  { %483 = vrot.lane.b32.xlu1 %v2024_v10, %s1951_s10 }
 0x247   :  { %561 = vrot.lane.b32.xlu1 %v2027_v11, %s1951_s10 }
 0x2af   :  { %v315_v22 = vpop.xlane.xlu1 %314 }
 0x2b0   :  { %v319_v23 = vsub.f32 %v311_v15, %v315_v22 }
 0x2b2   :  { %v321_v24 = vmul.f32 1.442695, %v319_v23 }
 0x2b3   :  { %v318_v25 = vpop.xlane.xlu1 %317 }
 0x2b4   :  { %1781 = vpow2.f32 %v321_v24  ;;  %v320_v26 = vsub.f32 %v312_v19, %v318_v25 }
 0x2b6   :  { %v323_v27 = vmul.f32 1.442695, %v320_v26 }
 0x2b7   :  { %v155_v28 = vpop.permute.xlu1 %154 }
 0x2b8   :  { %1783 = vpow2.f32 %v323_v27  ;;  %160 = vst.msk [vmem:[#allocation10] sm:$0xff] %vm62_vm0, %v155_v28  ;;  %1689 = vmatpush3.msra.mxu0 %v155_v28 }
 0x2b9   :  { %1698 = vmatprep.subr.mxu0 %v1947_v6 }
 0x2bb   :  { %v157_v29 = vpop.permute.xlu1 %156 }
 0x2bc   :  { %161 = vst.msk [vmem:[#allocation10 + $0x8] sm:$0xff] %vm62_vm0, %v157_v29  ;;  %1694 = vmatpush3.msra.mxu1 %v157_v29 }
 0x2bd   :  { %1703 = vmatprep.subr.mxu1 %v1947_v6 }
 0x2bf   :  { %v484_v34 = vpop.permute.xlu1 %483 }
 0x2c1   :  { %v1782_v30 = vpop.eup %1781 }
 0x2c2   :  { %v325_v31 = vsel %vm162_vm2, %v1782_v30, 0.0 }
 0x2c3   :  { %326 = vadd.xlane.f32.xlu0 %v325_v31  ;;  %v562_v35 = vpop.permute.xlu1 %561 }
 0x2c5   :  { %v1784_v32 = vpop.eup %1783 }
 0x2c6   :  { %v328_v33 = vsel %vm162_vm2, %v1784_v32, 0.0 }
 0x2c7   :  { %329 = vadd.xlane.f32.xlu1 %v328_v33 }
 0x2d8   :  { %559 = vrot.lane.b32.xlu1 %v2027_v11, %s1952_s11 }
 0x2d9   :  { %481 = vrot.lane.b32.xlu0 %v2024_v10, %s1952_s11 }
 0x34c   :  { %v327_v36 = vpop.xlane.xlu0 %326 }
 0x34d   :  { %1785 = vrcp.f32 %v327_v36 }
 0x350   :  { %v330_v37 = vpop.xlane.xlu1 %329  ;;  %v482_v42 = vpop.permute.xlu0 %481 }
 0x351   :  { %1787 = vrcp.f32 %v330_v37 }
 0x354   :  { %v560_v43 = vpop.permute.xlu1 %559 }
 0x35a   :  { %v1786_v38 = vpop.eup %1785 }
 0x35b   :  { %v2058_v39 = vmul.f32 %v1786_v38, %v1782_v30 }
 0x35d   :  { %1691 = vmatmul.mubr.msk.f32.vlgmr.msra.gmra.mxu0 %vm162_vm2, %v2058_v39 }
 0x35e   :  { %v1788_v40 = vpop.eup %1787  ;;  %1699 = vmatpush3.xpose.msk.msra.mxu0 %vm162_vm2, %v484_v34  ;;  %1700 = vmatprep.mubr.msk.f32.mxu0 %vm1948_vm1, %v1947_v6 }
 0x35f   :  { %v2065_v41 = vmul.f32 %v1788_v40, %v1784_v32  ;;  %1708 = vmatprep.subr.mxu0 %v1947_v6 }
 0x361   :  { %1696 = vmatmul.mubr.msk.f32.vlgmr.msra.gmra.mxu1 %vm162_vm2, %v2065_v41  ;;  %1701 = vmatmul.mubr.msk.f32.vlgmr.msra.gmra.mxu0 %vm162_vm2, %v482_v42 }
 0x362   :  { %1704 = vmatpush3.xpose.msk.msra.mxu1 %vm162_vm2, %v562_v35  ;;  %1705 = vmatprep.mubr.msk.f32.mxu1 %vm1948_vm1, %v1947_v6 }
 0x363   :  { %1713 = vmatprep.subr.mxu1 %v1947_v6  ;;  %1710 = vmatprep.mubr.msk.f32.mxu0 %vm1948_vm1, %v1947_v6 }
 0x365   :  { %1706 = vmatmul.mubr.msk.f32.vlgmr.msra.gmra.mxu1 %vm162_vm2, %v560_v43 }
 0x366   :  { %1715 = vmatprep.mubr.msk.f32.mxu1 %vm1948_vm1, %v1947_v6 }
 0x41d   :  { %v2080_v44 = vpop.f32.mrf.mxu0 }
 0x41f   :  { %v1692_v45 = vpop.f32.mrf.mxu0 }
 0x421   :  { %v2082_v46 = vpop.f32.mrf.mxu1  ;;  %v555_v47 = vpop.f32.mrf.mxu0 }
 0x422   :  { %v637_v48 = vmul.f32 0.35355338, %v555_v47 }
 0x423   :  { %v1697_v49 = vpop.f32.mrf.mxu1  ;;  %v1702_v50 = vpop.f32.mrf.mxu0 }
 0x424   :  { %v639_v51 = vsel %vm162_vm2, %v637_v48, -inf }
 0x425   :  { %v633_v52 = vpop.f32.mrf.mxu1  ;;  %640 = vmax.xlane.f32.xlu1 %v639_v51 }
 0x426   :  { %v638_v53 = vmul.f32 0.35355338, %v633_v52 }
 0x427   :  { %v1707_v54 = vpop.f32.mrf.mxu1 }
 0x428   :  { %v642_v55 = vsel %vm162_vm2, %v638_v53, -inf }
 0x429   :  { %643 = vmax.xlane.f32.xlu0 %v642_v55 }
 0x436   :  { %661 = vrot.lane.b32.xlu1 %v2024_v10, %s1953_s12 }
 0x43a   :  { %815 = vrot.lane.b32.xlu1 %v2024_v10, %s1954_s13 }
 0x43e   :  { %893 = vrot.lane.b32.xlu1 %v2027_v11, %s1954_s13 }
 0x43f   :  { %737 = vrot.lane.b32.xlu0 %v2027_v11, %s1953_s12 }
 0x443   :  { %813 = vrot.lane.b32.xlu0 %v2024_v10, %s1955_s14 }
 0x4ae   :  { %v641_v56 = vpop.xlane.xlu1 %640 }
 0x4af   :  { %v645_v57 = vsub.f32 %v637_v48, %v641_v56 }
 0x4b1   :  { %v647_v58 = vmul.f32 1.442695, %v645_v57 }
 0x4b2   :  { %v662_v59 = vpop.permute.xlu1 %661  ;;  %v644_v60 = vpop.xlane.xlu0 %643 }
 0x4b3   :  { %1789 = vpow2.f32 %v647_v58  ;;  %v646_v61 = vsub.f32 %v638_v53, %v644_v60  ;;  %1709 = vmatpush3.msra.mxu0 %v662_v59 }
 0x4b4   :  { %1718 = vmatprep.subr.mxu0 %v1947_v6 }
 0x4b5   :  { %v649_v62 = vmul.f32 1.442695, %v646_v61 }
 0x4b6   :  { %v738_v63 = vpop.permute.xlu0 %737  ;;  %v816_v4 = vpop.permute.xlu1 %815 }
 0x4b7   :  { %1791 = vpow2.f32 %v649_v62  ;;  %1714 = vmatpush3.msra.mxu1 %v738_v63 }
 0x4b8   :  { %1723 = vmatprep.subr.mxu1 %v1947_v6 }
 0x4ba   :  { %v894_v5 = vpop.permute.xlu1 %893  ;;  %v814_v15 = vpop.permute.xlu0 %813 }
 0x4c0   :  { %v1790_v0 = vpop.eup %1789 }
 0x4c1   :  { %v651_v1 = vsel %vm162_vm2, %v1790_v0, 0.0 }
 0x4c2   :  { %652 = vadd.xlane.f32.xlu1 %v651_v1 }
 0x4c4   :  { %v1792_v2 = vpop.eup %1791 }
 0x4c5   :  { %v654_v3 = vsel %vm162_vm2, %v1792_v2, 0.0 }
 0x4c6   :  { %655 = vadd.xlane.f32.xlu1 %v654_v3 }
 0x4d7   :  { %891 = vrot.lane.b32.xlu1 %v2027_v11, %s1955_s14 }
 0x54b   :  { %v653_v7 = vpop.xlane.xlu1 %652 }
 0x54c   :  { %1793 = vrcp.f32 %v653_v7 }
 0x54f   :  { %v656_v8 = vpop.xlane.xlu1 %655 }
 0x550   :  { %1795 = vrcp.f32 %v656_v8 }
 0x553   :  { %v892_v16 = vpop.permute.xlu1 %891 }
 0x559   :  { %v1794_v9 = vpop.eup %1793 }
 0x55a   :  { %v2096_v12 = vmul.f32 %v1794_v9, %v1790_v0 }
 0x55c   :  { %1711 = vmatmul.mubr.msk.f32.vlgmr.msra.gmra.mxu0 %vm162_vm2, %v2096_v12 }
 0x55d   :  { %v1796_v13 = vpop.eup %1795  ;;  %1719 = vmatpush3.xpose.msk.msra.mxu0 %vm162_vm2, %v816_v4  ;;  %1720 = vmatprep.mubr.msk.f32.mxu0 %vm1948_vm1, %v1947_v6 }
 0x55e   :  { %v2103_v14 = vmul.f32 %v1796_v13, %v1792_v2  ;;  %1728 = vmatprep.subr.mxu0 %v1947_v6 }
 0x560   :  { %1716 = vmatmul.mubr.msk.f32.vlgmr.msra.gmra.mxu1 %vm162_vm2, %v2103_v14  ;;  %1721 = vmatmul.mubr.msk.f32.vlgmr.msra.gmra.mxu0 %vm162_vm2, %v814_v15 }
 0x561   :  { %1724 = vmatpush3.xpose.msk.msra.mxu1 %vm162_vm2, %v894_v5  ;;  %1725 = vmatprep.mubr.msk.f32.mxu1 %vm1948_vm1, %v1947_v6 }
 0x562   :  { %1733 = vmatprep.subr.mxu1 %v1947_v6  ;;  %1730 = vmatprep.mubr.msk.f32.mxu0 %vm1948_vm1, %v1947_v6 }
 0x564   :  { %1726 = vmatmul.mubr.msk.f32.vlgmr.msra.gmra.mxu1 %vm162_vm2, %v892_v16 }
 0x565   :  { %1735 = vmatprep.mubr.msk.f32.mxu1 %vm1948_vm1, %v1947_v6 }
 0x61c   :  { %v2118_v17 = vpop.f32.mrf.mxu0 }
 0x61e   :  { %v1712_v18 = vpop.f32.mrf.mxu0 }
 0x620   :  { %v2120_v19 = vpop.f32.mrf.mxu1  ;;  %v887_v20 = vpop.f32.mrf.mxu0 }
 0x621   :  { %v969_v21 = vmul.f32 0.35355338, %v887_v20 }
 0x622   :  { %v1717_v22 = vpop.f32.mrf.mxu1  ;;  %v1722_v23 = vpop.f32.mrf.mxu0 }
 0x623   :  { %v971_v24 = vsel %vm162_vm2, %v969_v21, -inf }
 0x624   :  { %v965_v25 = vpop.f32.mrf.mxu1  ;;  %972 = vmax.xlane.f32.xlu0 %v971_v24 }
 0x625   :  { %v970_v26 = vmul.f32 0.35355338, %v965_v25 }
 0x626   :  { %v1727_v27 = vpop.f32.mrf.mxu1 }
 0x627   :  { %v974_v28 = vsel %vm162_vm2, %v970_v26, -inf }
 0x628   :  { %975 = vmax.xlane.f32.xlu1 %v974_v28 }
 0x639   :  { %993 = vrot.lane.b32.xlu1 %v2024_v10, %s1956_s15 }
 0x63d   :  { %1147 = vrot.lane.b32.xlu1 %v2024_v10, %s1957_s16 }
 0x641   :  { %1225 = vrot.lane.b32.xlu1 %v2027_v11, %s1957_s16 }
 0x645   :  { %1223 = vrot.lane.b32.xlu1 %v2027_v11, %s1958_s17 }
 0x6ad   :  { %v973_v29 = vpop.xlane.xlu0 %972 }
 0x6ae   :  { %v977_v30 = vsub.f32 %v969_v21, %v973_v29 }
 0x6b0   :  { %v979_v31 = vmul.f32 1.442695, %v977_v30 }
 0x6b1   :  { %v976_v32 = vpop.xlane.xlu1 %975 }
 0x6b2   :  { %1797 = vpow2.f32 %v979_v31  ;;  %v978_v33 = vsub.f32 %v970_v26, %v976_v32 }
 0x6b4   :  { %v981_v34 = vmul.f32 1.442695, %v978_v33 }
 0x6b5   :  { %v994_v35 = vpop.permute.xlu1 %993 }
 0x6b6   :  { %1799 = vpow2.f32 %v981_v34  ;;  %1729 = vmatpush3.msra.mxu0 %v994_v35 }
 0x6b7   :  { %1738 = vmatprep.subr.mxu0 %v1947_v6 }
 0x6b9   :  { %v1148_v47 = vpop.permute.xlu1 %1147 }
 0x6bd   :  { %v1226_v51 = vpop.permute.xlu1 %1225 }
 0x6bf   :  { %v1798_v36 = vpop.eup %1797 }
 0x6c0   :  { %v983_v37 = vsel %vm162_vm2, %v1798_v36, 0.0 }
 0x6c1   :  { %984 = vadd.xlane.f32.xlu0 %v983_v37  ;;  %v1224_v54 = vpop.permute.xlu1 %1223 }
 0x6c3   :  { %v1800_v38 = vpop.eup %1799 }
 0x6c4   :  { %v986_v40 = vsel %vm162_vm2, %v1800_v38, 0.0 }
 0x6c5   :  { %987 = vadd.xlane.f32.xlu0 %v986_v40 }
 0x6db   :  { %1069 = vrot.lane.b32.xlu0 %v2027_v11, %s1956_s15 }
 0x6df   :  { %1145 = vrot.lane.b32.xlu0 %v2024_v10, %s1958_s17 }
 0x74a   :  { %v985_v42 = vpop.xlane.xlu0 %984 }
 0x74b   :  { %1801 = vrcp.f32 %v985_v42 }
 0x74e   :  { %v988_v43 = vpop.xlane.xlu0 %987 }
 0x74f   :  { %1803 = vrcp.f32 %v988_v43 }
 0x752   :  { %v1070_v45 = vpop.permute.xlu0 %1069 }
 0x753   :  { %1734 = vmatpush3.msra.mxu1 %v1070_v45 }
 0x754   :  { %1743 = vmatprep.subr.mxu1 %v1947_v6 }
 0x756   :  { %v1146_v53 = vpop.permute.xlu0 %1145 }
 0x758   :  { %v1802_v48 = vpop.eup %1801 }
 0x759   :  { %v991_v49 = vmul.f32 %v1802_v48, %v1798_v36 }
 0x75b   :  { %1731 = vmatmul.mubr.msk.f32.vlgmr.msra.gmra.mxu0 %vm162_vm2, %v991_v49 }
 0x75c   :  { %v1804_v50 = vpop.eup %1803  ;;  %1739 = vmatpush3.xpose.msk.msra.mxu0 %vm162_vm2, %v1148_v47  ;;  %1740 = vmatprep.mubr.msk.f32.mxu0 %vm1948_vm1, %v1947_v6 }
 0x75d   :  { %v992_v52 = vmul.f32 %v1804_v50, %v1800_v38  ;;  %1748 = vmatprep.subr.mxu0 %v1947_v6 }
 0x75f   :  { %1736 = vmatmul.mubr.msk.f32.vlgmr.msra.gmra.mxu1 %vm162_vm2, %v992_v52  ;;  %1741 = vmatmul.mubr.msk.f32.vlgmr.msra.gmra.mxu0 %vm162_vm2, %v1146_v53 }
 0x760   :  { %1744 = vmatpush3.xpose.msk.msra.mxu1 %vm162_vm2, %v1226_v51  ;;  %1745 = vmatprep.mubr.msk.f32.mxu1 %vm1948_vm1, %v1947_v6 }
 0x761   :  { %1753 = vmatprep.subr.mxu1 %v1947_v6  ;;  %1750 = vmatprep.mubr.msk.f32.mxu0 %vm1948_vm1, %v1947_v6 }
 0x763   :  { %1746 = vmatmul.mubr.msk.f32.vlgmr.msra.gmra.mxu1 %vm162_vm2, %v1224_v54 }
 0x764   :  { %1755 = vmatprep.mubr.msk.f32.mxu1 %vm1948_vm1, %v1947_v6 }
 0x81b   :  { %v1065_v55 = vpop.f32.mrf.mxu0 }
 0x81d   :  { %v1732_v56 = vpop.f32.mrf.mxu0 }
 0x81f   :  { %v1141_v57 = vpop.f32.mrf.mxu1  ;;  %v1219_v58 = vpop.f32.mrf.mxu0 }
 0x820   :  { %v1301_v59 = vmul.f32 0.35355338, %v1219_v58 }
 0x821   :  { %v1737_v60 = vpop.f32.mrf.mxu1  ;;  %v1742_v61 = vpop.f32.mrf.mxu0 }
 0x822   :  { %v1303_v62 = vsel %vm162_vm2, %v1301_v59, -inf }
 0x823   :  { %v1297_v63 = vpop.f32.mrf.mxu1  ;;  %1304 = vmax.xlane.f32.xlu0 %v1303_v62 }
 0x824   :  { %v1302_v0 = vmul.f32 0.35355338, %v1297_v63 }
 0x825   :  { %v1747_v1 = vpop.f32.mrf.mxu1 }
 0x826   :  { %v1306_v2 = vsel %vm162_vm2, %v1302_v0, -inf }
 0x827   :  { %1307 = vmax.xlane.f32.xlu1 %v1306_v2 }
 0x838   :  { %1325 = vrot.lane.b32.xlu1 %v2024_v10, %s1959_s18 }
 0x83c   :  { %1479 = vrot.lane.b32.xlu1 %v2118_v17, %s1945_s25 }
 0x840   :  { %1481 = vrot.lane.b32.xlu1 %v2120_v19, %s1945_s25 }
 0x844   :  { %1511 = vrot.lane.b32.xlu1 %v2103_v14, %s1945_s25 }
 0x848   :  { %1489 = vrot.lane.b32.xlu1 %v1141_v57, %s1960_s19 }
 0x84c   :  { %1517 = vrot.lane.b32.xlu1 %v992_v52, %s1960_s19 }
 0x8ac   :  { %v1305_v6 = vpop.xlane.xlu0 %1304 }
 0x8ad   :  { %v1309_v3 = vsub.f32 %v1301_v59, %v1305_v6 }
 0x8af   :  { %v1311_v4 = vmul.f32 1.442695, %v1309_v3 }
 0x8b0   :  { %v1308_v5 = vpop.xlane.xlu1 %1307 }
 0x8b1   :  { %1805 = vpow2.f32 %v1311_v4  ;;  %v1310_v7 = vsub.f32 %v1302_v0, %v1308_v5 }
 0x8b3   :  { %v1313_v8 = vmul.f32 1.442695, %v1310_v7 }
 0x8b4   :  { %v1326_v10 = vpop.permute.xlu1 %1325 }
 0x8b5   :  { %1807 = vpow2.f32 %v1313_v8  ;;  %1749 = vmatpush3.msra.mxu0 %v1326_v10 }
 0x8be   :  { %v1806_v9 = vpop.eup %1805 }
 0x8bf   :  { %v1315_v13 = vsel %vm162_vm2, %v1806_v9, 0.0 }
 0x8c0   :  { %1316 = vadd.xlane.f32.xlu0 %v1315_v13 }
 0x8c2   :  { %v1808_v15 = vpop.eup %1807 }
 0x8c3   :  { %v1318_v14 = vsel %vm162_vm2, %v1808_v15, 0.0 }
 0x8c4   :  { %1319 = vadd.xlane.f32.xlu0 %v1318_v14 }
 0x8da   :  { %1401 = vrot.lane.b32.xlu0 %v2027_v11, %s1959_s18 }
 0x8de   :  { %1509 = vrot.lane.b32.xlu0 %v2096_v12, %s1945_s25 }
 0x8e2   :  { %1487 = vrot.lane.b32.xlu0 %v1065_v55, %s1960_s19 }
 0x8e6   :  { %1515 = vrot.lane.b32.xlu0 %v991_v49, %s1960_s19 }
 0x949   :  { %v1317_v16 = vpop.xlane.xlu0 %1316 }
 0x94a   :  { %1809 = vrcp.f32 %v1317_v16 }
 0x94d   :  { %v1320_v17 = vpop.xlane.xlu0 %1319 }
 0x94e   :  { %1811 = vrcp.f32 %v1320_v17 }
 0x951   :  { %v1402_v18 = vpop.permute.xlu0 %1401 }
 0x952   :  { %1754 = vmatpush3.msra.mxu1 %v1402_v18 }
 0x957   :  { %v1810_v19 = vpop.eup %1809 }
 0x958   :  { %v1323_v20 = vmul.f32 %v1810_v19, %v1806_v9 }
 0x95a   :  { %1751 = vmatmul.mubr.msk.f32.vlgmr.msra.gmra.mxu0 %vm162_vm2, %v1323_v20 }
 0x95b   :  { %v1812_v21 = vpop.eup %1811 }
 0x95c   :  { %v1324_v22 = vmul.f32 %v1812_v21, %v1808_v15 }
 0x95e   :  { %1756 = vmatmul.mubr.msk.f32.vlgmr.msra.gmra.mxu1 %vm162_vm2, %v1324_v22 }
 0x95f   :  { %1864 = shalt.err (!%p1861_p0)
}
 0x960   :  { %1560 = dma.vmem_to_hbm [thread:$0]  %s1555_s21, 256, %s2214_s4, [#allocation9], %s1944_s24, %s1944_s24, %s1945_s25  }
 0x961   :  { %s1962_s27 = smov [#allocation10]   ;;  %s1963_s29 = smov 24  }
 0x962   :  { %s1566_s28 = sshll.u32 %s1962_s27, 4  ;;  %s1567_s28 = int_to_ptr.vmem [resolvable:$true] %s1566_s28 }
 0x963   :  { %s1873_s30 = scalar_lea.vmem %s1567_s28, 256  ;;  %p1878_p2 = scmp.lt.s32.totalorder %s1567_s28, %s1567_s28 }
 0x964   :  { %p1874_p1 = scmp.ne.s32.totalorder %s1567_s28, %s1873_s30  ;;  %p1879_p3 = scmp.lt.s32.totalorder %s1873_s30, %s1873_s30 }
 0x966   :  { %p1880_p4 = por %p1879_p3, %p1878_p2 }
 0x968   :  { %p1881_p5 = pnand %p1880_p4, %p1874_p1 }
 0xa1a   :  { %v1397_v11 = vpop.f32.mrf.mxu0 }
 0xa1b   :  { %1495 = vrot.lane.b32.xlu0 %v1397_v11, %s1963_s29 }
 0xa1c   :  { %v1752_v12 = vpop.f32.mrf.mxu0 }
 0xa1d   :  { %1884 = shalt.err (!%p1881_p5)
}
 0xa1e   :  { %1572 = dma.vmem_to_hbm [thread:$0]  %s1567_s28, 256, %s2215_s5, [#allocation9], %s1944_s24, %s1944_s24, %s1945_s25   ;;  %v1473_v23 = vpop.f32.mrf.mxu1  ;;  %v1480_v25 = vpop.permute.xlu1 %1479  ;;  %vm1506_vm3 = vcmask 195584   ;;  %vm1503_vm4 = vcmask 130048  }
 0xa1f   :  { %1497 = vrot.lane.b32.xlu1 %v1473_v23, %s1963_s29  ;;  %1521 = vrot.lane.b32.xlu0 %v1323_v20, %s1963_s29  ;;  %v1510_v27 = vpop.permute.xlu0 %1509  ;;  %v1501_v32 = vsel %vm162_vm2, %v2080_v44, %v1480_v25  ;;  %s1964_s4 = smov [#allocation7]   ;;  %s1965_s0 = smov [#allocation11]  }
 0xa20   :  { %v1757_v24 = vpop.f32.mrf.mxu1  ;;  %s1542_s5 = sshll.u32 %s1964_s4, 4  ;;  %v1527_v38 = vsel %vm162_vm2, %v2058_v39, %v1510_v27  ;;  %s1578_s1 = sshll.u32 %s1965_s0, 4  ;;  %s1543_s5 = int_to_ptr.vmem [resolvable:$true] %s1542_s5  ;;  %s1579_s1 = int_to_ptr.vmem [resolvable:$true] %s1578_s1 }
 0xa21   :  { %s1893_s9 = scalar_lea.vmem %s1543_s5, 256  ;;  %p1898_p7 = scmp.lt.s32.totalorder %s1543_s5, %s1543_s5 }
 0xa22   :  { %v1482_v26 = vpop.permute.xlu1 %1481  ;;  %p1894_p6 = scmp.ne.s32.totalorder %s1543_s5, %s1893_s9  ;;  %p1899_p8 = scmp.lt.s32.totalorder %s1893_s9, %s1893_s9 }
 0xa23   :  { %1523 = vrot.lane.b32.xlu1 %v1324_v22, %s1963_s29  ;;  %v1488_v29 = vpop.permute.xlu0 %1487  ;;  %v1502_v37 = vsel %vm162_vm2, %v2082_v46, %v1482_v26 }
 0xa24   :  { %v1504_v34 = vsel %vm1503_vm4, %v1501_v32, %v1488_v29  ;;  %p1900_p9 = por %p1899_p8, %p1898_p7 }
 0xa26   :  { %v1512_v28 = vpop.permute.xlu1 %1511  ;;  %p1901_p10 = pnand %p1900_p9, %p1894_p6 }
 0xa27   :  { %v1516_v31 = vpop.permute.xlu0 %1515  ;;  %v1528_v39 = vsel %vm162_vm2, %v2065_v41, %v1512_v28 }
 0xa28   :  { %v1529_v44 = vsel %vm1503_vm4, %v1527_v38, %v1516_v31 }
 0xa2a   :  { %v1490_v30 = vpop.permute.xlu1 %1489 }
 0xa2b   :  { %v1505_v40 = vsel %vm1503_vm4, %v1502_v37, %v1490_v30 }
 0xa2e   :  { %v1518_v33 = vpop.permute.xlu1 %1517 }
 0xa8d   :  { %v1496_v35 = vpop.permute.xlu0 %1495 }
 0xa8e   :  { %v1507_v36 = vsel %vm1506_vm3, %v1504_v34, %v1496_v35 }
 0xa8f   :  { %1533 = vst.msk [vmem:[#allocation7] sm:$0xff] %vm62_vm0, %v1507_v36 }
 0xa91   :  { %v1498_v42 = vpop.permute.xlu1 %1497  ;;  %v1522_v43 = vpop.permute.xlu0 %1521 }
 0xa92   :  { %v1508_v45 = vsel %vm1506_vm3, %v1505_v40, %v1498_v42  ;;  %v1531_v47 = vsel %vm1506_vm3, %v1529_v44, %v1522_v43 }
 0xa93   :  { %1534 = vst.msk [vmem:[#allocation7 + $0x8] sm:$0xff] %vm62_vm0, %v1508_v45  ;;  %1535 = vst.msk [vmem:[#allocation11] sm:$0xff] %vm62_vm0, %v1531_v47 }
 0xa94   :  { %1904 = shalt.err (!%p1901_p10)
}
 0xa95   :  { %1548 = dma.vmem_to_hbm [thread:$0]  %s1543_s5, 256, %s2213_s3, [#allocation4], %s1944_s24, %s1944_s24, %s1945_s25   ;;  %v1530_v46 = vsel %vm1503_vm4, %v1528_v39, %v1518_v33  ;;  %v1524_v48 = vpop.permute.xlu1 %1523 }
 0xa96   :  { %v1532_v41 = vsel %vm1506_vm3, %v1530_v46, %v1524_v48  ;;  %s1913_s11 = scalar_lea.vmem %s1579_s1, 256  ;;  %p1918_p12 = scmp.lt.s32.totalorder %s1579_s1, %s1579_s1 }
 0xa97   :  { %1536 = vst.msk [vmem:[#allocation11 + $0x8] sm:$0xff] %vm62_vm0, %v1532_v41  ;;  %p1914_p11 = scmp.ne.s32.totalorder %s1579_s1, %s1913_s11  ;;  %p1919_p13 = scmp.lt.s32.totalorder %s1913_s11, %s1913_s11 }
 0xa99   :  { %p1920_p0 = por %p1919_p13, %p1918_p12 }
 0xa9b   :  { %p1921_p1 = pnand %p1920_p0, %p1914_p11 }
 0xa9d   :  { %1924 = shalt.err (!%p1921_p1)
}
 0xa9e   :  { %1584 = dma.vmem_to_hbm [thread:$0]  %s1579_s1, 256, %s2216_s6, [#allocation12], %s1944_s24, %s1944_s24, %s1945_s25  }
 0xa9f   :  { %1937 = dma.done.wait [#allocation4], 256  }
 0xaa0   :  { %1938 = vsyncadd [#allocation4], 4294967040 }
 0xaa1   :  { %1939 = dma.done.wait [#allocation9], 512  }
 0xaa2   :  { %1940 = vsyncadd [#allocation9], 4294966784 }
 0xaa3   :  { %1941 = dma.done.wait [#allocation12], 256  }
 0xaa4   :  { %1942 = vsyncadd [#allocation12], 4294967040 }
 0xaa5   :  { %1597 = vsyncpa [#allocation3], 1 }
 0xaa6   :  { %1598 = vsyncpa [#allocation6], 1 }
 0xaa7   :  { %1599 = vsyncpa [#allocation4], 1 }
 0xaa8   :  { %1600 = vsyncpa [#allocation9], 1 }
 0xaa9   :  { %1601 = vsyncpa [#allocation12], 1 }

</bundles_post_ra>
